<compile_context>
chip_gen: v6e
topology: v6e:2x2x1
jax: 0.10.0
libtpu: 0.0.40
codegen_flags: <defaults>
</compile_context>

<pallas_src>
import functools
import math

import jax
import jax.numpy as jnp
from jax.experimental import pallas as pl
from jax.experimental.pallas import tpu as pltpu


# --------------------------------------------------------------------------------------
# Tile-size helper: largest multiple of `align` that evenly divides `dim` and is
# <= preferred; falls back to the full dim (always legal for BlockSpec).
# --------------------------------------------------------------------------------------

def _pick_tile(dim, preferred, align):
    if dim <= preferred:
        return dim
    t = (min(preferred, dim) // align) * align
    while t >= align:
        if dim % t == 0:
            return t
        t -= align
    return dim


# --------------------------------------------------------------------------------------
# Tiled linear: y = act(x @ W + b), bf16 operands on the MXU, f32 VMEM accumulator.
# --------------------------------------------------------------------------------------

def _linear_kernel(x_ref, w_ref, b_ref, o_ref, acc_ref, *, act):
    @pl.when(pl.program_id(2) == 0)
    def _():
        acc_ref[...] = jnp.zeros_like(acc_ref)

    acc_ref[...] += jnp.dot(x_ref[...], w_ref[...],
                            preferred_element_type=jnp.float32)

    @pl.when(pl.program_id(2) == pl.num_programs(2) - 1)
    def _():
        y = acc_ref[...] + b_ref[...].astype(jnp.float32)
        if act == "gelu":
            # tanh-approximate GELU (close to HF erf-GELU; EUP tanh keeps VALU free)
            c = jnp.float32(math.sqrt(2.0 / math.pi))
            y = 0.5 * y * (1.0 + jnp.tanh(c * (y + jnp.float32(0.044715) * y * y * y)))
        elif act == "tanh":
            y = jnp.tanh(y)
        o_ref[...] = y.astype(o_ref.dtype)


def pallas_linear(x, w, b, act="none", out_dtype=None, tm=256, tn=512, tk=512):
    M, K = x.shape
    K2, N = w.shape
    assert K == K2
    out_dtype = out_dtype or x.dtype
    tm = _pick_tile(M, tm, 8)
    tn = _pick_tile(N, tn, 128)
    tk = _pick_tile(K, tk, 128)
    grid = (M // tm, N // tn, K // tk)
    kernel = functools.partial(_linear_kernel, act=act)
    return pl.pallas_call(
        kernel,
        out_shape=jax.ShapeDtypeStruct((M, N), out_dtype),
        grid_spec=pltpu.PrefetchScalarGridSpec(
            num_scalar_prefetch=0,
            grid=grid,
            in_specs=[
                pl.BlockSpec((tm, tk), lambda i, j, k: (i, k)),
                pl.BlockSpec((tk, tn), lambda i, j, k: (k, j)),
                pl.BlockSpec((1, tn), lambda i, j, k: (0, j)),
            ],
            out_specs=pl.BlockSpec((tm, tn), lambda i, j, k: (i, j)),
            scratch_shapes=[pltpu.VMEM((tm, tn), jnp.float32)],
        ),
        compiler_params=pltpu.CompilerParams(
            dimension_semantics=("parallel", "parallel", "arbitrary"),
            vmem_limit_bytes=64 * 1024 * 1024,
        ),
    )(x, w, b.reshape(1, N))


# --------------------------------------------------------------------------------------
# Row-tiled LayerNorm (optionally fused with residual add); eps = 1e-12 (BERT).
# --------------------------------------------------------------------------------------

def _layernorm_f32(h, g, b):
    mu = jnp.mean(h, axis=-1, keepdims=True)
    var = jnp.mean(jnp.square(h - mu), axis=-1, keepdims=True)
    y = (h - mu) * jax.lax.rsqrt(var + jnp.float32(1e-12))
    return y * g + b


def _ln_kernel(x_ref, g_ref, b_ref, o_ref):
    h = x_ref[...].astype(jnp.float32)
    o_ref[...] = _layernorm_f32(h, g_ref[...].astype(jnp.float32),
                                b_ref[...].astype(jnp.float32)).astype(o_ref.dtype)


def _ln_res_kernel(x_ref, r_ref, g_ref, b_ref, o_ref):
    h = x_ref[...].astype(jnp.float32) + r_ref[...].astype(jnp.float32)
    o_ref[...] = _layernorm_f32(h, g_ref[...].astype(jnp.float32),
                                b_ref[...].astype(jnp.float32)).astype(o_ref.dtype)


def pallas_layernorm(x, gamma, beta, tm=512):
    M, H = x.shape
    tm = _pick_tile(M, tm, 8)
    return pl.pallas_call(
        _ln_kernel,
        out_shape=jax.ShapeDtypeStruct((M, H), x.dtype),
        grid=(M // tm,),
        in_specs=[
            pl.BlockSpec((tm, H), lambda i: (i, 0)),
            pl.BlockSpec((1, H), lambda i: (0, 0)),
            pl.BlockSpec((1, H), lambda i: (0, 0)),
        ],
        out_specs=pl.BlockSpec((tm, H), lambda i: (i, 0)),
        compiler_params=pltpu.CompilerParams(dimension_semantics=("parallel",)),
    )(x, gamma.reshape(1, H), beta.reshape(1, H))


def pallas_layernorm_residual(x, residual, gamma, beta, tm=512):
    M, H = x.shape
    tm = _pick_tile(M, tm, 8)
    return pl.pallas_call(
        _ln_res_kernel,
        out_shape=jax.ShapeDtypeStruct((M, H), x.dtype),
        grid=(M // tm,),
        in_specs=[
            pl.BlockSpec((tm, H), lambda i: (i, 0)),
            pl.BlockSpec((tm, H), lambda i: (i, 0)),
            pl.BlockSpec((1, H), lambda i: (0, 0)),
            pl.BlockSpec((1, H), lambda i: (0, 0)),
        ],
        out_specs=pl.BlockSpec((tm, H), lambda i: (i, 0)),
        compiler_params=pltpu.CompilerParams(dimension_semantics=("parallel",)),
    )(x, residual, gamma.reshape(1, H), beta.reshape(1, H))


# --------------------------------------------------------------------------------------
# Attention: per-batch block over the fused qkv [S, 3H]; heads sliced inside the kernel,
# softmax in f32, probs cast to bf16 for p@v, output written lane-dense as [S, H].
# --------------------------------------------------------------------------------------

def _attn_kernel(qkv_ref, m_ref, o_ref, *, scale, n_heads, d_h, hidden):
    qkv = qkv_ref[0]                              # [S, 3H] bf16
    bias = m_ref[0, 0].astype(jnp.float32)        # [1, S] additive mask bias
    ctxs = []
    for h in range(n_heads):
        q = qkv[:, h * d_h:(h + 1) * d_h]                       # [S, D] bf16
        k = qkv[:, hidden + h * d_h: hidden + (h + 1) * d_h]    # [S, D] bf16
        v = qkv[:, 2 * hidden + h * d_h: 2 * hidden + (h + 1) * d_h]
        # q @ k^T via dot_general contraction on D (no explicit transpose), f32 acc.
        s = jax.lax.dot_general(q, k, (((1,), (1,)), ((), ())),
                                preferred_element_type=jnp.float32)
        s = s * jnp.float32(scale) + bias
        s = s - jnp.max(s, axis=-1, keepdims=True)
        p = jnp.exp(s)
        p = p * pl.reciprocal(jnp.sum(p, axis=-1, keepdims=True), approx=True)
        ctxs.append(jnp.dot(p.astype(v.dtype), v,
                            preferred_element_type=jnp.float32))
    # single lane-dense store of the merged heads: [S, n_heads * D] = [S, H]
    o_ref[0] = jnp.concatenate(ctxs, axis=-1).astype(o_ref.dtype)


def pallas_attention(qkv, mask_bias, *, scale, n_heads, d_h, hidden):
    B, S, threeH = qkv.shape
    kernel = functools.partial(_attn_kernel, scale=scale, n_heads=n_heads,
                               d_h=d_h, hidden=hidden)
    return pl.pallas_call(
        kernel,
        out_shape=jax.ShapeDtypeStruct((B, S, hidden), qkv.dtype),
        grid=(B,),
        in_specs=[
            pl.BlockSpec((1, S, threeH), lambda b: (b, 0, 0)),
            pl.BlockSpec((1, 1, 1, S), lambda b: (b, 0, 0, 0)),
        ],
        out_specs=pl.BlockSpec((1, S, hidden), lambda b: (b, 0, 0)),
        compiler_params=pltpu.CompilerParams(dimension_semantics=("parallel",)),
    )(qkv, mask_bias)


# --------------------------------------------------------------------------------------
# Parameters (deterministic synthetic init; matmul weights stored in bf16)
# --------------------------------------------------------------------------------------

def init_params(key, cfg):
    H, I = cfg["hidden"], cfg["intermediate"]
    wdt = jnp.bfloat16

    def nrm(k, shape, dtype=wdt):
        return (0.02 * jax.random.normal(k, shape, dtype=jnp.float32)).astype(dtype)

    keys = jax.random.split(key, 4 + cfg["layers"])
    p = {
        "word_emb": nrm(keys[0], (cfg["vocab"], H), jnp.float32),
        "pos_emb": nrm(keys[1], (cfg["max_pos"], H), jnp.float32),
        "type_emb": nrm(keys[2], (2, H), jnp.float32),
        "emb_ln_g": jnp.ones((H,), jnp.float32),
        "emb_ln_b": jnp.zeros((H,), jnp.float32),
    }
    layers = []
    for li in range(cfg["layers"]):
        lk = jax.random.split(keys[4 + li], 6)
        wq, wk, wv = nrm(lk[0], (H, H)), nrm(lk[1], (H, H)), nrm(lk[2], (H, H))
        layers.append(dict(
            w_qkv=jnp.concatenate([wq, wk, wv], axis=1),          # fused [H, 3H]
            b_qkv=jnp.zeros((3 * H,), jnp.float32),
            wo=nrm(lk[3], (H, H)), bo=jnp.zeros((H,), jnp.float32),
            ln1_g=jnp.ones((H,), jnp.float32), ln1_b=jnp.zeros((H,), jnp.float32),
            w1=nrm(lk[4], (H, I)), b1=jnp.zeros((I,), jnp.float32),
            w2=nrm(lk[5], (I, H)), b2=jnp.zeros((H,), jnp.float32),
            ln2_g=jnp.ones((H,), jnp.float32), ln2_b=jnp.zeros((H,), jnp.float32),
        ))
    p["layers"] = layers
    kp, kc = jax.random.split(keys[3], 2)
    p["pool_w"] = nrm(kp, (H, H))
    p["pool_b"] = jnp.zeros((H,), jnp.float32)
    p["cls_w"] = nrm(kc, (H, cfg["num_labels"]))
    p["cls_b"] = jnp.zeros((cfg["num_labels"],), jnp.float32)
    return p


# --------------------------------------------------------------------------------------
# Forward pass (mirrors BERTClassifier.forward, inference mode)
# --------------------------------------------------------------------------------------

def bert_classifier_forward(params, input_ids, attention_mask, cfg):
    B, S = input_ids.shape
    H = cfg["hidden"]
    n_heads = cfg["heads"]
    d_h = H // n_heads
    compute_dtype = jnp.bfloat16

    # ---- embeddings (gathers are glue, plain JAX); token_type hard-coded to segment 0 ----
    x = (params["word_emb"][input_ids]
         + params["pos_emb"][:S][None, :, :]
         + params["type_emb"][0][None, None, :])                  # [B, S, H] f32
    x = x.astype(compute_dtype).reshape(B * S, H)
    x = pallas_layernorm(x, params["emb_ln_g"], params["emb_ln_b"])
    # embedding dropout(0.1): inference mode -> identity

    # ---- extended attention-mask bias (HF convention), kept in f32 ----
    mask_bias = ((1.0 - attention_mask.astype(jnp.float32)) * jnp.float32(-10000.0))
    mask_bias = mask_bias.reshape(B, 1, 1, S)
    scale = 1.0 / math.sqrt(d_h)

    # ---- transformer encoder layers ----
    for layer in params["layers"]:
        qkv = pallas_linear(x, layer["w_qkv"], layer["b_qkv"])    # [B*S, 3H] bf16 (fused QKV)
        ctx = pallas_attention(qkv.reshape(B, S, 3 * H), mask_bias,
                               scale=scale, n_heads=n_heads, d_h=d_h, hidden=H)
        ctx = ctx.reshape(B * S, H)                               # lane-dense, no transpose
        attn_out = pallas_linear(ctx, layer["wo"], layer["bo"])
        x = pallas_layernorm_residual(attn_out, x, layer["ln1_g"], layer["ln1_b"])
        ffn = pallas_linear(x, layer["w1"], layer["b1"], act="gelu")
        ffn = pallas_linear(ffn, layer["w2"], layer["b2"])
        x = pallas_layernorm_residual(ffn, x, layer["ln2_g"], layer["ln2_b"])

    # ---- pooler: tanh(Linear(hidden_state of [CLS])) ----
    cls = x.reshape(B, S, H)[:, 0, :]                             # [B, H]
    pooled = pallas_linear(cls, params["pool_w"], params["pool_b"], act="tanh")

    # ---- self.dropout(pooled): p=0.1, inference mode -> identity ----
    # ---- self.classifier(pooled) ----
    logits = pallas_linear(pooled, params["cls_w"], params["cls_b"],
                           out_dtype=jnp.float32)
    return logits


# --------------------------------------------------------------------------------------

if __name__ == "__main__":
    cfg = dict(vocab=100, hidden=32, heads=2, intermediate=64,
               layers=2, max_pos=16, num_labels=3)
    B, S = 2, 8

    key = jax.random.PRNGKey(0)
    k_params, k_ids = jax.random.split(key, 2)
    params = init_params(k_params, cfg)

    input_ids = jax.random.randint(k_ids, (B, S), 0, cfg["vocab"], dtype=jnp.int32)
    attention_mask = jnp.array(
        [[1] * S,
         [1] * (S - 2) + [0, 0]], dtype=jnp.int32)

    logits = bert_classifier_forward(params, input_ids, attention_mask, cfg)
    logits = jax.block_until_ready(logits)
    assert logits.shape == (B, cfg["num_labels"])
    assert bool(jnp.all(jnp.isfinite(logits)))
    print("KERNEL_OK")
</pallas_src>

<mosaic_0001>
module attributes {stable_mosaic.version = 11 : i64} {
  func.func @_ln_kernel(%arg0: i32, %arg1: memref<16x32xbf16, #tpu.memory_space<vmem>>, %arg2: memref<1x32xf32, #tpu.memory_space<vmem>>, %arg3: memref<1x32xf32, #tpu.memory_space<vmem>>, %arg4: memref<16x32xbf16, #tpu.memory_space<vmem>>) attributes {dimension_semantics = [#tpu.dimension_semantics<parallel>], iteration_bounds = array<i64: 1>, scalar_prefetch = 0 : i64, scratch_operands = 0 : i64, tpu.core_type = #tpu.core_type<tc>, window_params = [{transform_indices = @transform_0, window_bounds = array<i64: 16, 32>}, {pipeline_mode = #tpu.pipeline_mode<synchronous>, transform_indices = @transform_1, window_bounds = array<i64: 1, 32>}, {pipeline_mode = #tpu.pipeline_mode<synchronous>, transform_indices = @transform_2, window_bounds = array<i64: 1, 32>}, {transform_indices = @transform_3, window_bounds = array<i64: 16, 32>}]} {
    %c0 = arith.constant 0 : index
    %c0_0 = arith.constant 0 : index
    %0 = vector.load %arg1[%c0, %c0_0] : memref<16x32xbf16, #tpu.memory_space<vmem>>, vector<16x32xbf16>
    %1 = arith.extf %0 : vector<16x32xbf16> to vector<16x32xf32>
    %c0_1 = arith.constant 0 : index
    %c0_2 = arith.constant 0 : index
    %2 = vector.load %arg2[%c0_1, %c0_2] : memref<1x32xf32, #tpu.memory_space<vmem>>, vector<1x32xf32>
    %c0_3 = arith.constant 0 : index
    %c0_4 = arith.constant 0 : index
    %3 = vector.load %arg3[%c0_3, %c0_4] : memref<1x32xf32, #tpu.memory_space<vmem>>, vector<1x32xf32>
    %cst = arith.constant dense<0.000000e+00> : vector<16xf32>
    %4 = vector.multi_reduction <add>, %1, %cst [1] : vector<16x32xf32> to vector<16xf32>
    %5 = vector.shape_cast %4 : vector<16xf32> to vector<16x1xf32>
    %cst_5 = arith.constant 3.200000e+01 : f32
    %6 = vector.broadcast %cst_5 : f32 to vector<16x1xf32>
    %7 = arith.divf %5, %6 : vector<16x1xf32>
    %8 = vector.broadcast %7 : vector<16x1xf32> to vector<16x32xf32>
    %9 = arith.subf %1, %8 : vector<16x32xf32>
    %10 = arith.mulf %9, %9 : vector<16x32xf32>
    %cst_6 = arith.constant dense<0.000000e+00> : vector<16xf32>
    %11 = vector.multi_reduction <add>, %10, %cst_6 [1] : vector<16x32xf32> to vector<16xf32>
    %12 = vector.shape_cast %11 : vector<16xf32> to vector<16x1xf32>
    %cst_7 = arith.constant 3.200000e+01 : f32
    %13 = vector.broadcast %cst_7 : f32 to vector<16x1xf32>
    %14 = arith.divf %12, %13 : vector<16x1xf32>
    %15 = vector.broadcast %7 : vector<16x1xf32> to vector<16x32xf32>
    %16 = arith.subf %1, %15 : vector<16x32xf32>
    %cst_8 = arith.constant 9.99999996E-13 : f32
    %17 = vector.broadcast %cst_8 : f32 to vector<16x1xf32>
    %18 = arith.addf %14, %17 : vector<16x1xf32>
    %19 = math.rsqrt %18 : vector<16x1xf32>
    %20 = vector.broadcast %19 : vector<16x1xf32> to vector<16x32xf32>
    %21 = arith.mulf %16, %20 : vector<16x32xf32>
    %22 = vector.broadcast %2 : vector<1x32xf32> to vector<16x32xf32>
    %23 = arith.mulf %21, %22 : vector<16x32xf32>
    %24 = vector.broadcast %3 : vector<1x32xf32> to vector<16x32xf32>
    %25 = arith.addf %23, %24 : vector<16x32xf32>
    %26 = arith.truncf %25 : vector<16x32xf32> to vector<16x32xbf16>
    %c0_9 = arith.constant 0 : index
    %c0_10 = arith.constant 0 : index
    %27 = vector.load %arg4[%c0_9, %c0_10] : memref<16x32xbf16, #tpu.memory_space<vmem>>, vector<16x32xbf16>
    tpu.vector_store %arg4[%c0_9, %c0_10], %26 {strides = array<i32>} : memref<16x32xbf16, #tpu.memory_space<vmem>>, vector<16x32xbf16>,
    return
  }
  func.func @transform_0(%arg0: i32) -> (i32, i32) {
    %c0_i32 = arith.constant 0 : i32
    %c0_i32_0 = arith.constant 0 : i32
    return %arg0, %c0_i32 : i32, i32
  }
  func.func @transform_1(%arg0: i32) -> (i32, i32) {
    %c0_i32 = arith.constant 0 : i32
    %c0_i32_0 = arith.constant 0 : i32
    %c0_i32_1 = arith.constant 0 : i32
    return %c0_i32, %c0_i32_0 : i32, i32
  }
  func.func @transform_2(%arg0: i32) -> (i32, i32) {
    %c0_i32 = arith.constant 0 : i32
    %c0_i32_0 = arith.constant 0 : i32
    %c0_i32_1 = arith.constant 0 : i32
    return %c0_i32, %c0_i32_0 : i32, i32
  }
  func.func @transform_3(%arg0: i32) -> (i32, i32) {
    %c0_i32 = arith.constant 0 : i32
    %c0_i32_0 = arith.constant 0 : i32
    return %arg0, %c0_i32 : i32, i32
  }
}

</mosaic_0001>

<bundles_post_ra>
// kernel: tpu_custom_call.1
= control target key start
LH: loop header
LB: loop body
LE: loop exit
PB: predicated region body
PF: predicated region fallthrough
CT: control target
= control target key end

     0   :  { %8 = vsyncpa [#allocation3], 0  ;;  %s215_s0 = inlined_call_operand.hbm [shape: bf16[16,32], index: 0, kind: input, shape index: {}]   ;;  %s216_s1 = inlined_call_operand.vmem [shape: f32[1,32], index: 1, kind: input, shape index: {}]   ;;  %s217_s2 = inlined_call_operand.vmem [shape: f32[1,32], index: 2, kind: input, shape index: {}]   ;;  %s218_s3 = inlined_call_operand.hbm [shape: bf16[16,32], index: 3, kind: output, shape index: {}]  }
   0x1   :  { %9 = vsyncpa [#allocation4], 0  ;;  %s169_s12 = smov [#allocation2]  }
   0x2   :  { %s15_s13 = sshll.u32 %s169_s12, 4  ;;  %s16_s13 = int_to_ptr.vmem [resolvable:$true] %s15_s13 }
   0x3   :  { %s133_s14 = scalar_lea.vmem %s16_s13, 128  ;;  %p138_p1 = scmp.lt.s32.totalorder %s16_s13, %s16_s13 }
   0x4   :  { %p134_p0 = scmp.ne.s32.totalorder %s16_s13, %s133_s14  ;;  %p139_p2 = scmp.lt.s32.totalorder %s133_s14, %s133_s14 }
   0x6   :  { %p140_p3 = por %p139_p2, %p138_p1 }
   0x8   :  { %p141_p4 = pnand %p140_p3, %p134_p0 }
   0xa   :  { %144 = shalt.err (!%p141_p4)
}
   0xb   :  { %s170_s15 = smov 64   ;;  %s171_s16 = smov 4  }
   0xc   :  { %21 = dma.hbm_to_vmem [thread:$0]  %s215_s0, 128, %s16_s13, [#allocation3], %s170_s15, %s170_s15, %s171_s16  }
   0xd   :  { %165 = dma.done.wait [#allocation3], 128  }
   0xe   :  { %166 = vsyncadd [#allocation3], 4294967168  ;;  %v114_v0 = vld [vmem:[#allocation2] sm:$0xff]   ;;  %vm35_vm0 = vcmask 261120   ;;  %vm87_vm1 = vcmask 257024   ;;  %s172_s22 = smov [#allocation5]  }
   0xf   :  { %v115_v1 = vunpack.c.l.bf16 %v114_v0  ;;  %v116_v2 = vunpack.c.h.bf16 %v114_v0  ;;  %v107_v22 = vld [vmem:[%s216_s1] ss:$0 sm:$0xff]  ;;  %s95_s23 = sshll.u32 %s172_s22, 4  ;;  %s96_s23 = int_to_ptr.vmem [resolvable:$true] %s95_s23 }
  0x10   :  { %v108_v24 = vld [vmem:[%s217_s2] ss:$0 sm:$0xff]  ;;  %s145_s1 = scalar_lea.vmem %s96_s23, 128  ;;  %p150_p6 = scmp.lt.s32.totalorder %s96_s23, %s96_s23 }
  0x11   :  { %v36_v3 = vsel %vm35_vm0, %v115_v1, 0.0  ;;  %v39_v4 = vsel %vm35_vm0, %v116_v2, 0.0  ;;  %p146_p5 = scmp.ne.s32.totalorder %s96_s23, %s145_s1  ;;  %p151_p7 = scmp.lt.s32.totalorder %s145_s1, %s145_s1 }
  0x12   :  { %37 = vadd.xlane.f32.xlu0 %v36_v3 }
  0x13   :  { %p152_p8 = por %p151_p7, %p150_p6 }
  0x15   :  { %p153_p9 = pnand %p152_p8, %p146_p5 }
  0x16   :  { %40 = vadd.xlane.f32.xlu0 %v39_v4 }
  0x9b   :  { %v38_v5 = vpop.xlane.xlu0 %37 }
  0x9c   :  { %v43_v6 = vmul.f32 0.03125, %v38_v5 }
  0x9e   :  { %v45_v7 = vsub.f32 %v115_v1, %v43_v6 }
  0x9f   :  { %v41_v8 = vpop.xlane.xlu0 %40 }
  0xa0   :  { %v44_v9 = vmul.f32 0.03125, %v41_v8  ;;  %v47_v10 = vmul.f32 %v45_v7, %v45_v7 }
  0xa2   :  { %v46_v11 = vsub.f32 %v116_v2, %v44_v9  ;;  %v49_v12 = vsel %vm35_vm0, %v47_v10, 0.0 }
  0xa3   :  { %50 = vadd.xlane.f32.xlu1 %v49_v12 }
  0xa4   :  { %v48_v13 = vmul.f32 %v46_v11, %v46_v11 }
  0xa6   :  { %v52_v14 = vsel %vm35_vm0, %v48_v13, 0.0 }
  0xa7   :  { %53 = vadd.xlane.f32.xlu1 %v52_v14 }
 0x12c   :  { %v51_v15 = vpop.xlane.xlu1 %50 }
 0x12d   :  { %v55_v16 = vmul.f32 0.03125, %v51_v15 }
 0x12f   :  { %v57_v17 = vadd.f32 1e-12, %v55_v16 }
 0x130   :  { %v54_v18 = vpop.xlane.xlu1 %53 }
 0x131   :  { %121 = vrsqrt.f32 %v57_v17  ;;  %v56_v19 = vmul.f32 0.03125, %v54_v18 }
 0x133   :  { %v58_v20 = vadd.f32 1e-12, %v56_v19 }
 0x135   :  { %123 = vrsqrt.f32 %v58_v20 }
 0x13e   :  { %v122_v21 = vpop.eup %121 }
 0x13f   :  { %v61_v23 = vmul.f32 %v122_v21, %v45_v7 }
 0x141   :  { %v69_v25 = vmul.f32 %v107_v22, %v61_v23 }
 0x142   :  { %v124_v26 = vpop.eup %123 }
 0x143   :  { %v62_v27 = vmul.f32 %v124_v26, %v46_v11  ;;  %v77_v28 = vadd.f32 %v108_v24, %v69_v25 }
 0x145   :  { %v70_v29 = vmul.f32 %v107_v22, %v62_v27  ;;  %v111_v30 = vpack.c.bf16 %v77_v28, %v77_v28 }
 0x147   :  { %v78_v31 = vadd.f32 %v108_v24, %v70_v29  ;;  %88 = vst.msk [vmem:[#allocation5] sm:$0xf] %vm87_vm1, %v111_v30 }
 0x149   :  { %v112_v32 = vpack.c.bf16 %v78_v31, %v78_v31 }
 0x14b   :  { %89 = vst.msk [vmem:[#allocation5 + $0x4] sm:$0xf] %vm87_vm1, %v112_v32 }
 0x14c   :  { %156 = shalt.err (!%p153_p9)
}
 0x14d   :  { %101 = dma.vmem_to_hbm [thread:$0]  %s96_s23, 128, %s218_s3, [#allocation4], %s170_s15, %s170_s15, %s171_s16  }
 0x14e   :  { %167 = dma.done.wait [#allocation4], 128  }
 0x14f   :  { %168 = vsyncadd [#allocation4], 4294967168 }
 0x150   :  { %105 = vsyncpa [#allocation3], 1 }
 0x151   :  { %106 = vsyncpa [#allocation4], 1 }

</bundles_post_ra>
